<compile_context>
chip_gen: v6e
topology: v6e:2x2x1
jax: 0.10.0
libtpu: 0.0.40
codegen_flags: <defaults>
</compile_context>

<pallas_src>
import functools

import jax
import jax.numpy as jnp
from jax.experimental import pallas as pl
from jax.experimental.pallas import tpu as pltpu

D_PAD = 128          # lane-dense padded feature width for all hidden/output layers
D_IN, D_OUT = 93, 9  # logical (unpadded) input / output feature sizes


def _round_up(x, m):
    return (x + m - 1) // m * m


# ----------------------------- Pallas kernel ---------------------------------


def _mlp_kernel(x_ref, w1_ref, w_ref, b_ref, o_ref):
    """Fused 4-layer MLP forward for one batch tile.

    x arrives as f32 (tile_b, 93) and is cast to bf16 in-kernel (cheap VPU work,
    saves an HBM pass).  Hidden/output dims are padded to 128 so every matmul is
    a clean MXU tile and the store is a full-lane, unmasked bf16 write.
    """
    x = x_ref[...].astype(jnp.bfloat16)                               # (tb, 93)

    # layer 1: (tb, 93) @ (93, 128) -- Mosaic masks the ragged K internally
    h = jnp.dot(x, w1_ref[...], preferred_element_type=jnp.float32) + b_ref[0]
    h = jnp.maximum(h, 0.0).astype(jnp.bfloat16)

    # layer 2
    h = jnp.dot(h, w_ref[0], preferred_element_type=jnp.float32) + b_ref[1]
    h = jnp.maximum(h, 0.0).astype(jnp.bfloat16)

    # layer 3
    h = jnp.dot(h, w_ref[1], preferred_element_type=jnp.float32) + b_ref[2]
    h = jnp.maximum(h, 0.0).astype(jnp.bfloat16)

    # layer 4: no ReLU (matches Model.forward); lane-dense 128-wide bf16 store
    out = jnp.dot(h, w_ref[2], preferred_element_type=jnp.float32) + b_ref[3]
    o_ref[...] = out.astype(o_ref.dtype)


# ------------------------------- wrapper --------------------------------------


@functools.partial(jax.jit, static_argnames=("tile_b",))
def mlp_forward(x, packed_params, *, tile_b=2048):
    """Fused MLP forward. `packed_params` = (w1 (93,128) bf16, w_rest (3,128,128) bf16,
    biases (4,1,128) f32).  Returns f32 logits of shape (n, 9)."""
    n = x.shape[0]
    w1, w_rest, b_all = packed_params

    # --- batch tiling: big tiles (multiple of 8 rows), single tile for small n.
    #     No forced multi-tile split: v5e/v6e are 1 TC/chip; on v7x tiny tiles
    #     are overhead-dominated.  Large n naturally yields many 'parallel' tiles.
    n8 = _round_up(max(n, 8), 8)
    tb = min(_round_up(tile_b, 8), n8)
    n_pad = _round_up(n8, tb)

    # Only pad rows when the batch is not already tile-aligned (no feature pad,
    # no dtype cast -> no extra HBM pass over x in the common case).
    if n_pad != n:
        x = jnp.pad(x, ((0, n_pad - n), (0, 0)))

    out = pl.pallas_call(
        _mlp_kernel,
        out_shape=jax.ShapeDtypeStruct((n_pad, D_PAD), jnp.bfloat16),
        grid=(n_pad // tb,),
        in_specs=[
            pl.BlockSpec((tb, D_IN), lambda i: (i, 0)),          # x tile, raw f32
            pl.BlockSpec((D_IN, D_PAD), lambda i: (0, 0)),       # w1 (whole)
            pl.BlockSpec((3, D_PAD, D_PAD), lambda i: (0, 0, 0)),  # w2..w4 stacked
            pl.BlockSpec((4, 1, D_PAD), lambda i: (0, 0, 0)),      # biases stacked
        ],
        out_specs=pl.BlockSpec((tb, D_PAD), lambda i: (i, 0)),
        compiler_params=pltpu.CompilerParams(
            dimension_semantics=("parallel",)),
    )(x, w1, w_rest, b_all)

    # slice off padding lanes/rows and return f32 logits (module semantics)
    return out[:n, :D_OUT].astype(jnp.float32)


# ------------------------- deterministic param init --------------------------


def init_params(key):
    """Mimics torch.nn.Linear default init (uniform(-1/sqrt(fan_in), +1/sqrt(fan_in))).

    Weights stored as (in, out) — already transposed vs PyTorch's (out, in).
    """
    sizes = [(93, 64), (64, 32), (32, 16), (16, 9)]
    params = []
    for (fan_in, fan_out) in sizes:
        key, kw, kb = jax.random.split(key, 3)
        bound = 1.0 / jnp.sqrt(float(fan_in))
        w = jax.random.uniform(kw, (fan_in, fan_out), jnp.float32, -bound, bound)
        b = jax.random.uniform(kb, (1, fan_out), jnp.float32, -bound, bound)
        params.extend([w, b])
    return tuple(params)


def pack_params(params, d_pad=D_PAD):
    """Pack the 8 params into 3 operands:
       w1     : (93, 128)      bf16  (out-dim zero-padded)
       w_rest : (3, 128, 128)  bf16  (w2, w3, w4, both dims zero-padded)
       b_all  : (4, 1, 128)    f32   (all biases, zero-padded)
    Zero padding keeps the math identical on the logical lanes."""
    w1, b1, w2, b2, w3, b3, w4, b4 = params

    def pad_w_full(w):
        return jnp.pad(w, ((0, d_pad - w.shape[0]),
                           (0, d_pad - w.shape[1]))).astype(jnp.bfloat16)

    def pad_b(b):
        return jnp.pad(b, ((0, 0), (0, d_pad - b.shape[1]))).astype(jnp.float32)

    w1p = jnp.pad(w1, ((0, 0), (0, d_pad - w1.shape[1]))).astype(jnp.bfloat16)
    w_rest = jnp.stack([pad_w_full(w2), pad_w_full(w3), pad_w_full(w4)])
    b_all = jnp.stack([pad_b(b1), pad_b(b2), pad_b(b3), pad_b(b4)])
    return w1p, w_rest, b_all


# ------------------------------ references ------------------------------------


def mlp_reference(x, params):
    """Plain-JAX f32 reference (matches the PyTorch module's forward)."""
    w1, b1, w2, b2, w3, b3, w4, b4 = params
    h = jnp.maximum(x @ w1 + b1, 0.0)
    h = jnp.maximum(h @ w2 + b2, 0.0)
    h = jnp.maximum(h @ w3 + b3, 0.0)
    return h @ w4 + b4


def mlp_reference_bf16(x, params):
    """Reference mirroring the kernel's precision (bf16 operands, f32 accumulation,
    f32 bias/ReLU, final bf16 store)."""
    w1, b1, w2, b2, w3, b3, w4, b4 = params
    h = x.astype(jnp.bfloat16)
    for w, bias, relu in ((w1, b1, True), (w2, b2, True), (w3, b3, True), (w4, b4, False)):
        h = jnp.dot(h, w.astype(jnp.bfloat16),
                    preferred_element_type=jnp.float32) + bias
        if relu:
            h = jnp.maximum(h, 0.0).astype(jnp.bfloat16)
    return h.astype(jnp.bfloat16).astype(jnp.float32)


# ----------------------------------- main -------------------------------------

if __name__ == "__main__":
    key = jax.random.PRNGKey(0)
    kx, kp = jax.random.split(key)

    batch = 256
    x = jax.random.normal(kx, (batch, D_IN), jnp.float32)
    params = init_params(kp)
    packed = pack_params(params)

    out = mlp_forward(x, packed, tile_b=2048)
    out = jax.block_until_ready(out)
    assert out.shape == (batch, D_OUT)

    # tight check vs a reference using the kernel's exact precision choices
    ref_bf16 = mlp_reference_bf16(x, params)
    assert jnp.allclose(out, ref_bf16, atol=2e-2, rtol=2e-2), "mismatch vs bf16-matched reference"

    # loose check vs the full-f32 module semantics (bf16 rounding tolerance)
    ref_f32 = mlp_reference(x, params)
    assert jnp.allclose(out, ref_f32, atol=1e-1, rtol=1e-1), "mismatch vs f32 reference"

    # exercise the ragged-batch path (row-padding only when batch not tile-aligned)
    x_small = jax.random.normal(kx, (50, D_IN), jnp.float32)
    out_small = jax.block_until_ready(mlp_forward(x_small, packed, tile_b=2048))
    assert out_small.shape == (50, D_OUT)
    assert jnp.allclose(out_small, mlp_reference_bf16(x_small, params),
                        atol=2e-2, rtol=2e-2), "mismatch on ragged batch"

    # TODO(synk): Model.predict (argmax + pandas get_dummies) is host-side
    # post-processing, not part of forward, so it is intentionally not a kernel.
    print("KERNEL_OK")
</pallas_src>

<mosaic_0001>
module attributes {stable_mosaic.version = 11 : i64} {
  func.func @_mlp_kernel(%arg0: i32, %arg1: memref<256x93xf32, #tpu.memory_space<vmem>>, %arg2: memref<93x128xbf16, #tpu.memory_space<vmem>>, %arg3: memref<3x128x128xbf16, #tpu.memory_space<vmem>>, %arg4: memref<4x1x128xf32, #tpu.memory_space<vmem>>, %arg5: memref<256x128xbf16, #tpu.memory_space<vmem>>) attributes {dimension_semantics = [#tpu.dimension_semantics<parallel>], iteration_bounds = array<i64: 1>, scalar_prefetch = 0 : i64, scratch_operands = 0 : i64, tpu.core_type = #tpu.core_type<tc>, window_params = [{transform_indices = @transform_0, window_bounds = array<i64: 256, 93>}, {pipeline_mode = #tpu.pipeline_mode<synchronous>, transform_indices = @transform_1, window_bounds = array<i64: 93, 128>}, {pipeline_mode = #tpu.pipeline_mode<synchronous>, transform_indices = @transform_2, window_bounds = array<i64: 3, 128, 128>}, {pipeline_mode = #tpu.pipeline_mode<synchronous>, transform_indices = @transform_3, window_bounds = array<i64: 4, 1, 128>}, {transform_indices = @transform_4, window_bounds = array<i64: 256, 128>}]} {
    %c0 = arith.constant 0 : index
    %c0_0 = arith.constant 0 : index
    %0 = vector.load %arg1[%c0, %c0_0] : memref<256x93xf32, #tpu.memory_space<vmem>>, vector<256x93xf32>
    %1 = arith.truncf %0 : vector<256x93xf32> to vector<256x93xbf16>
    %c0_1 = arith.constant 0 : index
    %c0_2 = arith.constant 0 : index
    %2 = vector.load %arg2[%c0_1, %c0_2] : memref<93x128xbf16, #tpu.memory_space<vmem>>, vector<93x128xbf16>
    %cst = arith.constant dense<0.000000e+00> : vector<256x128xf32>
    %3 = tpu.matmul %1, %2, %cst {dimension_numbers = #tpu.dot_dimension_numbers<[1], [0], [0], [1], [0, 0, 1, 1], [], []>} : vector<256x93xbf16>, vector<93x128xbf16>, vector<256x128xf32> -> vector<256x128xf32>
    %c0_3 = arith.constant 0 : index
    %c0_4 = arith.constant 0 : index
    %c0_5 = arith.constant 0 : index
    %4 = vector.load %arg4[%c0_3, %c0_4, %c0_5] : memref<4x1x128xf32, #tpu.memory_space<vmem>>, vector<1x1x128xf32>
    %5 = vector.shape_cast %4 : vector<1x1x128xf32> to vector<1x128xf32>
    %6 = vector.broadcast %5 : vector<1x128xf32> to vector<256x128xf32>
    %7 = arith.addf %3, %6 : vector<256x128xf32>
    %cst_6 = arith.constant 0.000000e+00 : f32
    %8 = vector.broadcast %cst_6 : f32 to vector<256x128xf32>
    %9 = arith.maximumf %7, %8 : vector<256x128xf32>
    %10 = arith.truncf %9 : vector<256x128xf32> to vector<256x128xbf16>
    %c0_7 = arith.constant 0 : index
    %c0_8 = arith.constant 0 : index
    %c0_9 = arith.constant 0 : index
    %11 = vector.load %arg3[%c0_7, %c0_8, %c0_9] : memref<3x128x128xbf16, #tpu.memory_space<vmem>>, vector<1x128x128xbf16>
    %12 = vector.shape_cast %11 : vector<1x128x128xbf16> to vector<128x128xbf16>
    %cst_10 = arith.constant dense<0.000000e+00> : vector<256x128xf32>
    %13 = tpu.matmul %10, %12, %cst_10 {dimension_numbers = #tpu.dot_dimension_numbers<[1], [0], [0], [1], [0, 0, 1, 1], [], []>} : vector<256x128xbf16>, vector<128x128xbf16>, vector<256x128xf32> -> vector<256x128xf32>
    %c1 = arith.constant 1 : index
    %c0_11 = arith.constant 0 : index
    %c0_12 = arith.constant 0 : index
    %14 = vector.load %arg4[%c1, %c0_11, %c0_12] : memref<4x1x128xf32, #tpu.memory_space<vmem>>, vector<1x1x128xf32>
    %15 = vector.shape_cast %14 : vector<1x1x128xf32> to vector<1x128xf32>
    %16 = vector.broadcast %15 : vector<1x128xf32> to vector<256x128xf32>
    %17 = arith.addf %13, %16 : vector<256x128xf32>
    %cst_13 = arith.constant 0.000000e+00 : f32
    %18 = vector.broadcast %cst_13 : f32 to vector<256x128xf32>
    %19 = arith.maximumf %17, %18 : vector<256x128xf32>
    %20 = arith.truncf %19 : vector<256x128xf32> to vector<256x128xbf16>
    %c1_14 = arith.constant 1 : index
    %c0_15 = arith.constant 0 : index
    %c0_16 = arith.constant 0 : index
    %21 = vector.load %arg3[%c1_14, %c0_15, %c0_16] : memref<3x128x128xbf16, #tpu.memory_space<vmem>>, vector<1x128x128xbf16>
    %22 = vector.shape_cast %21 : vector<1x128x128xbf16> to vector<128x128xbf16>
    %cst_17 = arith.constant dense<0.000000e+00> : vector<256x128xf32>
    %23 = tpu.matmul %20, %22, %cst_17 {dimension_numbers = #tpu.dot_dimension_numbers<[1], [0], [0], [1], [0, 0, 1, 1], [], []>} : vector<256x128xbf16>, vector<128x128xbf16>, vector<256x128xf32> -> vector<256x128xf32>
    %c2 = arith.constant 2 : index
    %c0_18 = arith.constant 0 : index
    %c0_19 = arith.constant 0 : index
    %24 = vector.load %arg4[%c2, %c0_18, %c0_19] : memref<4x1x128xf32, #tpu.memory_space<vmem>>, vector<1x1x128xf32>
    %25 = vector.shape_cast %24 : vector<1x1x128xf32> to vector<1x128xf32>
    %26 = vector.broadcast %25 : vector<1x128xf32> to vector<256x128xf32>
    %27 = arith.addf %23, %26 : vector<256x128xf32>
    %cst_20 = arith.constant 0.000000e+00 : f32
    %28 = vector.broadcast %cst_20 : f32 to vector<256x128xf32>
    %29 = arith.maximumf %27, %28 : vector<256x128xf32>
    %30 = arith.truncf %29 : vector<256x128xf32> to vector<256x128xbf16>
    %c2_21 = arith.constant 2 : index
    %c0_22 = arith.constant 0 : index
    %c0_23 = arith.constant 0 : index
    %31 = vector.load %arg3[%c2_21, %c0_22, %c0_23] : memref<3x128x128xbf16, #tpu.memory_space<vmem>>, vector<1x128x128xbf16>
    %32 = vector.shape_cast %31 : vector<1x128x128xbf16> to vector<128x128xbf16>
    %cst_24 = arith.constant dense<0.000000e+00> : vector<256x128xf32>
    %33 = tpu.matmul %30, %32, %cst_24 {dimension_numbers = #tpu.dot_dimension_numbers<[1], [0], [0], [1], [0, 0, 1, 1], [], []>} : vector<256x128xbf16>, vector<128x128xbf16>, vector<256x128xf32> -> vector<256x128xf32>
    %c3 = arith.constant 3 : index
    %c0_25 = arith.constant 0 : index
    %c0_26 = arith.constant 0 : index
    %34 = vector.load %arg4[%c3, %c0_25, %c0_26] : memref<4x1x128xf32, #tpu.memory_space<vmem>>, vector<1x1x128xf32>
    %35 = vector.shape_cast %34 : vector<1x1x128xf32> to vector<1x128xf32>
    %36 = vector.broadcast %35 : vector<1x128xf32> to vector<256x128xf32>
    %37 = arith.addf %33, %36 : vector<256x128xf32>
    %38 = arith.truncf %37 : vector<256x128xf32> to vector<256x128xbf16>
    %c0_27 = arith.constant 0 : index
    %c0_28 = arith.constant 0 : index
    %39 = vector.load %arg5[%c0_27, %c0_28] : memref<256x128xbf16, #tpu.memory_space<vmem>>, vector<256x128xbf16>
    tpu.vector_store %arg5[%c0_27, %c0_28], %38 {strides = array<i32>} : memref<256x128xbf16, #tpu.memory_space<vmem>>, vector<256x128xbf16>,
    return
  }
  func.func @transform_0(%arg0: i32) -> (i32, i32) {
    %c0_i32 = arith.constant 0 : i32
    %c0_i32_0 = arith.constant 0 : i32
    return %arg0, %c0_i32 : i32, i32
  }
  func.func @transform_1(%arg0: i32) -> (i32, i32) {
    %c0_i32 = arith.constant 0 : i32
    %c0_i32_0 = arith.constant 0 : i32
    %c0_i32_1 = arith.constant 0 : i32
    return %c0_i32, %c0_i32_0 : i32, i32
  }
  func.func @transform_2(%arg0: i32) -> (i32, i32, i32) {
    %c0_i32 = arith.constant 0 : i32
    %c0_i32_0 = arith.constant 0 : i32
    %c0_i32_1 = arith.constant 0 : i32
    %c0_i32_2 = arith.constant 0 : i32
    return %c0_i32, %c0_i32_0, %c0_i32_1 : i32, i32, i32
  }
  func.func @transform_3(%arg0: i32) -> (i32, i32, i32) {
    %c0_i32 = arith.constant 0 : i32
    %c0_i32_0 = arith.constant 0 : i32
    %c0_i32_1 = arith.constant 0 : i32
    %c0_i32_2 = arith.constant 0 : i32
    return %c0_i32, %c0_i32_0, %c0_i32_1 : i32, i32, i32
  }
  func.func @transform_4(%arg0: i32) -> (i32, i32) {
    %c0_i32 = arith.constant 0 : i32
    %c0_i32_0 = arith.constant 0 : i32
    return %arg0, %c0_i32 : i32, i32
  }
}

</mosaic_0001>

<bundles_post_ra>
// kernel: mlp_forward.1
= control target key start
LH: loop header
LB: loop body
LE: loop exit
PB: predicated region body
PF: predicated region fallthrough
CT: control target
= control target key end

     0   :  { %vm169_vm0 = vcmask 1045504   ;;  %vm170_vm1 = vcmask 1046528   ;;  %v1903_v1 = vmov 65535   ;;  %vm120_vm2 = vcmask 760832   ;;  %s2327_s1 = inlined_call_operand.vmem [shape: bf16[93,128], index: 1, kind: input, shape index: {}]   ;;  %s2328_s0 = inlined_call_operand.vmem [shape: f32[256,93], index: 0, kind: input, shape index: {}]   ;;  %s2329_s2 = inlined_call_operand.vmem [shape: bf16[3,128,128], index: 2, kind: input, shape index: {}]   ;;  %s2330_s3 = inlined_call_operand.vmem [shape: f32[4,1,128], index: 3, kind: input, shape index: {}]   ;;  %s2331_s4 = inlined_call_operand.vmem [shape: bf16[256,128], index: 4, kind: output, shape index: {}]  }
   0x1   :  { %v1873_v0 = vld [vmem:[%s2327_s1 + $0x28] sm:$0x7f]   ;;  %v171_v2 = vsel %vm169_vm0, 4294967295, %v1903_v1  ;;  %v1874_v5 = vld [vmem:[%s2327_s1 + $0x20] sm:$0xff]   ;;  %v1875_v8 = vld [vmem:[%s2327_s1 + $0x18] sm:$0xff]  }
   0x2   :  { %v172_v3 = vsel %vm170_vm1, %v171_v2, 0  ;;  %v18_v6 = vld [vmem:[%s2328_s0] sm:$0xff]  ;;  %v19_v7 = vld [vmem:[%s2328_s0 + $0x8] sm:$0xff]  ;;  %v1876_v10 = vld [vmem:[%s2327_s1 + $0x10] sm:$0xff]  }
   0x3   :  { %v174_v4 = vand.u32 %v1873_v0, %v172_v3  ;;  %v50_v9 = vpack.c.bf16 %v19_v7, %v18_v6  ;;  %v1877_v11 = vld [vmem:[%s2327_s1 + $0x8] sm:$0xff]   ;;  %v1879_v12 = vld [vmem:[%s2329_s2 + $0x38] sm:$0xff]   ;;  %v1880_v13 = vld [vmem:[%s2329_s2 + $0x30] sm:$0xff]  }
   0x4   :  { %v1878_v14 = vld [vmem:[%s2327_s1] sm:$0xff]   ;;  %1728 = vmatprep.subr.bf16.mxu1 %v1879_v12  ;;  %v20_v15 = vld [vmem:[%s2328_s0 + $0x10] sm:$0xff]  ;;  %v21_v16 = vld [vmem:[%s2328_s0 + $0x18] sm:$0xff] }
   0x5   :  { %1684 = vmatprep.subr.bf16.mxu0 %v174_v4  ;;  %1696 = vmatprep.mubr.msk.bf16.mxu0 %vm120_vm2, %v50_v9  ;;  %v22_v17 = vld [vmem:[%s2328_s0 + $0x20] sm:$0xff]  ;;  %v23_v18 = vld [vmem:[%s2328_s0 + $0x28] sm:$0xff]  ;;  %v51_v21 = vpack.c.bf16 %v21_v16, %v20_v15  ;;  %v1883_v23 = vld [vmem:[%s2329_s2 + $0x18] sm:$0xff]  }
   0x6   :  { %1685 = vmatpush3.bf16.msra.mxu0 %v174_v4  ;;  %1729 = vmatpush3.bf16.msra.mxu1 %v1879_v12  ;;  %v1881_v19 = vld [vmem:[%s2329_s2 + $0x28] sm:$0xff]   ;;  %v1882_v20 = vld [vmem:[%s2329_s2 + $0x20] sm:$0xff]   ;;  %v52_v22 = vpack.c.bf16 %v23_v18, %v22_v17  ;;  %v24_v24 = vld [vmem:[%s2328_s0 + $0x30] sm:$0xff] }
   0x7   :  { %1686 = vmatprep.subr.bf16.mxu0 %v1874_v5  ;;  %1730 = vmatprep.subr.bf16.mxu1 %v1880_v13  ;;  %v25_v25 = vld [vmem:[%s2328_s0 + $0x38] sm:$0xff]  ;;  %v26_v26 = vld [vmem:[%s2328_s0 + $0x40] sm:$0xff]  ;;  %v27_v27 = vld [vmem:[%s2328_s0 + $0x48] sm:$0xff] }
   0x8   :  { %v53_v28 = vpack.c.bf16 %v25_v25, %v24_v24  ;;  %v54_v29 = vpack.c.bf16 %v27_v27, %v26_v26  ;;  %v28_v30 = vld [vmem:[%s2328_s0 + $0x50] sm:$0xff]  ;;  %v29_v31 = vld [vmem:[%s2328_s0 + $0x58] sm:$0xff]  ;;  %v30_v32 = vld [vmem:[%s2328_s0 + $0x60] sm:$0xff] }
   0x9   :  { %v31_v33 = vld [vmem:[%s2328_s0 + $0x68] sm:$0xff]  ;;  %v55_v34 = vpack.c.bf16 %v29_v31, %v28_v30  ;;  %v32_v36 = vld [vmem:[%s2328_s0 + $0x70] sm:$0xff]  ;;  %v33_v37 = vld [vmem:[%s2328_s0 + $0x78] sm:$0xff] }
   0xa   :  { %1687 = vmatpush3.bf16.msra.mxu0 %v1874_v5  ;;  %1731 = vmatpush3.bf16.msra.mxu1 %v1880_v13  ;;  %v56_v35 = vpack.c.bf16 %v31_v33, %v30_v32  ;;  %v34_v38 = vld [vmem:[%s2328_s0 + $0x80] sm:$0xff]  ;;  %v35_v39 = vld [vmem:[%s2328_s0 + $0x88] sm:$0xff]  ;;  %v57_v40 = vpack.c.bf16 %v33_v37, %v32_v36  ;;  %v36_v42 = vld [vmem:[%s2328_s0 + $0x90] sm:$0xff] }
   0xb   :  { %1688 = vmatprep.subr.bf16.mxu0 %v1875_v8  ;;  %1732 = vmatprep.subr.bf16.mxu1 %v1881_v19  ;;  %v58_v41 = vpack.c.bf16 %v35_v39, %v34_v38  ;;  %v37_v43 = vld [vmem:[%s2328_s0 + $0x98] sm:$0xff]  ;;  %v38_v44 = vld [vmem:[%s2328_s0 + $0xa0] sm:$0xff]  ;;  %v39_v45 = vld [vmem:[%s2328_s0 + $0xa8] sm:$0xff] }
   0xc   :  { %v59_v46 = vpack.c.bf16 %v37_v43, %v36_v42  ;;  %v60_v47 = vpack.c.bf16 %v39_v45, %v38_v44  ;;  %v40_v48 = vld [vmem:[%s2328_s0 + $0xb0] sm:$0xff]  ;;  %v41_v49 = vld [vmem:[%s2328_s0 + $0xb8] sm:$0xff]  ;;  %v42_v50 = vld [vmem:[%s2328_s0 + $0xc0] sm:$0xff] }
   0xd   :  { %v43_v51 = vld [vmem:[%s2328_s0 + $0xc8] sm:$0xff]  ;;  %v61_v52 = vpack.c.bf16 %v41_v49, %v40_v48  ;;  %v44_v54 = vld [vmem:[%s2328_s0 + $0xd0] sm:$0xff]  ;;  %v45_v55 = vld [vmem:[%s2328_s0 + $0xd8] sm:$0xff] }
   0xe   :  { %1689 = vmatpush3.bf16.msra.mxu0 %v1875_v8  ;;  %1733 = vmatpush3.bf16.msra.mxu1 %v1881_v19  ;;  %v62_v53 = vpack.c.bf16 %v43_v51, %v42_v50  ;;  %v46_v56 = vld [vmem:[%s2328_s0 + $0xe0] sm:$0xff]  ;;  %v47_v57 = vld [vmem:[%s2328_s0 + $0xe8] sm:$0xff]  ;;  %v63_v58 = vpack.c.bf16 %v45_v55, %v44_v54  ;;  %v48_v60 = vld [vmem:[%s2328_s0 + $0xf0] sm:$0xff] }
   0xf   :  { %1690 = vmatprep.subr.bf16.mxu0 %v1876_v10  ;;  %1734 = vmatprep.subr.bf16.mxu1 %v1882_v20  ;;  %v64_v59 = vpack.c.bf16 %v47_v57, %v46_v56  ;;  %v49_v61 = vld [vmem:[%s2328_s0 + $0xf8] sm:$0xff]  ;;  %v1884_v63 = vld [vmem:[%s2329_s2 + $0x10] sm:$0xff]   ;;  %v1885_v0 = vld [vmem:[%s2329_s2 + $0x8] sm:$0xff]  }
  0x10   :  { %v65_v62 = vpack.c.bf16 %v49_v61, %v48_v60  ;;  %v1886_v1 = vld [vmem:[%s2329_s2] sm:$0xff]   ;;  %v1887_v2 = vld [vmem:[%s2329_s2 + $0x78] sm:$0xff]   ;;  %v1888_v3 = vld [vmem:[%s2329_s2 + $0x70] sm:$0xff]  }
  0x11   :  { %v1889_v4 = vld [vmem:[%s2329_s2 + $0x68] sm:$0xff]   ;;  %v1890_v5 = vld [vmem:[%s2329_s2 + $0x60] sm:$0xff]   ;;  %v1891_v6 = vld [vmem:[%s2329_s2 + $0x58] sm:$0xff]  }
  0x12   :  { %1691 = vmatpush3.bf16.msra.mxu0 %v1876_v10  ;;  %1735 = vmatpush3.bf16.msra.mxu1 %v1882_v20  ;;  %v1892_v7 = vld [vmem:[%s2329_s2 + $0x50] sm:$0xff]   ;;  %v1893_v8 = vld [vmem:[%s2329_s2 + $0x48] sm:$0xff]  }
  0x13   :  { %1692 = vmatprep.subr.bf16.mxu0 %v1877_v11  ;;  %1736 = vmatprep.subr.bf16.mxu1 %v1883_v23 }
  0x16   :  { %1693 = vmatpush3.bf16.msra.mxu0 %v1877_v11  ;;  %1737 = vmatpush3.bf16.msra.mxu1 %v1883_v23  ;;  %v2107_v11 = vld [vmem:[%s2330_s3] ss:$0 sm:$0xff] }
  0x17   :  { %1694 = vmatprep.subr.bf16.mxu0 %v1878_v14  ;;  %1738 = vmatprep.subr.bf16.mxu1 %v1884_v63 }
  0x1a   :  { %1695 = vmatpush3.bf16.msra.mxu0 %v1878_v14  ;;  %1739 = vmatpush3.bf16.msra.mxu1 %v1884_v63 }
  0x1b   :  { %1740 = vmatprep.subr.bf16.mxu1 %v1885_v0  ;;  %1776 = vmatprep.subr.bf16.mxu0 %v1887_v2 }
  0x1d   :  { %1697 = vmatmul.mubr.msk.bf16.vlgmr.msra.gmra.mxu0 %vm120_vm2, %v51_v21 }
  0x1e   :  { %1700 = vmatprep.mubr.msk.bf16.mxu0 %vm120_vm2, %v52_v22  ;;  %1741 = vmatpush3.bf16.msra.mxu1 %v1885_v0 }
  0x1f   :  { %1742 = vmatprep.subr.bf16.mxu1 %v1886_v1  ;;  %1777 = vmatpush3.bf16.msra.mxu0 %v1887_v2 }
  0x20   :  { %1778 = vmatprep.subr.bf16.mxu0 %v1888_v3 }
  0x22   :  { %1743 = vmatpush3.bf16.msra.mxu1 %v1886_v1 }
  0x23   :  { %1779 = vmatpush3.bf16.msra.mxu0 %v1888_v3 }
  0x24   :  { %1780 = vmatprep.subr.bf16.mxu0 %v1889_v4 }
  0x25   :  { %1701 = vmatmul.mubr.msk.bf16.gmra.mxu0 %vm120_vm2, %v53_v28 }
  0x26   :  { %1704 = vmatprep.mubr.msk.bf16.mxu0 %vm120_vm2, %v54_v29 }
  0x27   :  { %1781 = vmatpush3.bf16.msra.mxu0 %v1889_v4 }
  0x28   :  { %1782 = vmatprep.subr.bf16.mxu0 %v1890_v5 }
  0x2b   :  { %1783 = vmatpush3.bf16.msra.mxu0 %v1890_v5 }
  0x2c   :  { %1784 = vmatprep.subr.bf16.mxu0 %v1891_v6 }
  0x2d   :  { %1705 = vmatmul.mubr.msk.bf16.gmra.mxu0 %vm120_vm2, %v55_v34 }
  0x2e   :  { %1708 = vmatprep.mubr.msk.bf16.mxu0 %vm120_vm2, %v56_v35 }
  0x2f   :  { %1785 = vmatpush3.bf16.msra.mxu0 %v1891_v6 }
  0x30   :  { %1786 = vmatprep.subr.bf16.mxu0 %v1892_v7 }
  0x33   :  { %1787 = vmatpush3.bf16.msra.mxu0 %v1892_v7 }
  0x34   :  { %1788 = vmatprep.subr.bf16.mxu0 %v1893_v8 }
  0x35   :  { %1709 = vmatmul.mubr.msk.bf16.gmra.mxu0 %vm120_vm2, %v57_v40 }
  0x36   :  { %1712 = vmatprep.mubr.msk.bf16.mxu0 %vm120_vm2, %v58_v41 }
  0x37   :  { %1789 = vmatpush3.bf16.msra.mxu0 %v1893_v8 }
  0x3d   :  { %1713 = vmatmul.mubr.msk.bf16.gmra.mxu0 %vm120_vm2, %v59_v46 }
  0x3e   :  { %1716 = vmatprep.mubr.msk.bf16.mxu0 %vm120_vm2, %v60_v47 }
  0x45   :  { %1717 = vmatmul.mubr.msk.bf16.gmra.mxu0 %vm120_vm2, %v61_v52 }
  0x46   :  { %1720 = vmatprep.mubr.msk.bf16.mxu0 %vm120_vm2, %v62_v53 }
  0x4d   :  { %1721 = vmatmul.mubr.msk.bf16.gmra.mxu0 %vm120_vm2, %v63_v58 }
  0x4e   :  { %1724 = vmatprep.mubr.msk.bf16.mxu0 %vm120_vm2, %v64_v59 }
  0x55   :  { %1725 = vmatmul.mubr.msk.bf16.gmra.mxu0 %vm120_vm2, %v65_v62 }
  0xdd   :  { %v1698_v9 = vpop.f32.mrf.mxu0 }
  0xde   :  { %v219_v15 = vadd.f32 %v1698_v9, %v2107_v11 }
  0xdf   :  { %v210_v10 = vpop.f32.mrf.mxu0 }
  0xe0   :  { %v211_v13 = vadd.f32 %v2107_v11, %v210_v10  ;;  %v339_v22 = vmax.f32 %v219_v15, 0.0 }
  0xe1   :  { %v1699_v12 = vpop.f32.mrf.mxu0 }
  0xe2   :  { %v222_v14 = vadd.f32 %v1699_v12, %v2107_v11  ;;  %v337_v20 = vmax.f32 %v211_v13, 0.0 }
  0xe3   :  { %v213_v16 = vpop.f32.mrf.mxu0 }
  0xe4   :  { %v214_v17 = vadd.f32 %v2107_v11, %v213_v16  ;;  %v340_v18 = vmax.f32 %v222_v14, 0.0 }
  0xe5   :  { %v1702_v19 = vpop.f32.mrf.mxu0 }
  0xe6   :  { %v338_v21 = vmax.f32 %v214_v17, 0.0  ;;  %v370_v25 = vpack.c.bf16 %v340_v18, %v339_v22  ;;  %v235_v29 = vadd.f32 %v1702_v19, %v2107_v11 }
  0xe7   :  { %v226_v23 = vpop.f32.mrf.mxu0 }
  0xe8   :  { %v369_v24 = vpack.c.bf16 %v338_v21, %v337_v20  ;;  %v227_v27 = vadd.f32 %v2107_v11, %v226_v23  ;;  %v343_v36 = vmax.f32 %v235_v29, 0.0 }
  0xe9   :  { %v1703_v26 = vpop.f32.mrf.mxu0 }
  0xea   :  { %v238_v28 = vadd.f32 %v1703_v26, %v2107_v11  ;;  %1744 = vmatprep.mubr.bf16.mxu1 %v369_v24  ;;  %v341_v34 = vmax.f32 %v227_v27, 0.0 }
  0xeb   :  { %v229_v30 = vpop.f32.mrf.mxu0  ;;  %1745 = vmatmul.mubr.bf16.vlgmr.msra.gmra.mxu1 %v370_v25 }
  0xec   :  { %v230_v31 = vadd.f32 %v2107_v11, %v229_v30  ;;  %v344_v32 = vmax.f32 %v238_v28, 0.0 }
  0xed   :  { %v1706_v33 = vpop.f32.mrf.mxu0 }
  0xee   :  { %v342_v35 = vmax.f32 %v230_v31, 0.0  ;;  %v372_v39 = vpack.c.bf16 %v344_v32, %v343_v36  ;;  %v251_v43 = vadd.f32 %v1706_v33, %v2107_v11 }
  0xef   :  { %v242_v37 = vpop.f32.mrf.mxu0 }
  0xf0   :  { %v371_v38 = vpack.c.bf16 %v342_v35, %v341_v34  ;;  %v243_v41 = vadd.f32 %v2107_v11, %v242_v37  ;;  %v347_v50 = vmax.f32 %v251_v43, 0.0 }
  0xf1   :  { %v1707_v40 = vpop.f32.mrf.mxu0 }
  0xf2   :  { %v254_v42 = vadd.f32 %v1707_v40, %v2107_v11  ;;  %1748 = vmatprep.mubr.bf16.mxu1 %v371_v38  ;;  %v345_v48 = vmax.f32 %v243_v41, 0.0 }
  0xf3   :  { %v245_v44 = vpop.f32.mrf.mxu0  ;;  %1749 = vmatmul.mubr.bf16.gmra.mxu1 %v372_v39 }
  0xf4   :  { %v246_v45 = vadd.f32 %v2107_v11, %v245_v44  ;;  %v348_v46 = vmax.f32 %v254_v42, 0.0 }
  0xf5   :  { %v1710_v47 = vpop.f32.mrf.mxu0 }
  0xf6   :  { %v346_v49 = vmax.f32 %v246_v45, 0.0  ;;  %v374_v53 = vpack.c.bf16 %v348_v46, %v347_v50  ;;  %v267_v57 = vadd.f32 %v1710_v47, %v2107_v11 }
  0xf7   :  { %v258_v51 = vpop.f32.mrf.mxu0 }
  0xf8   :  { %v373_v52 = vpack.c.bf16 %v346_v49, %v345_v48  ;;  %v259_v55 = vadd.f32 %v2107_v11, %v258_v51  ;;  %v351_v0 = vmax.f32 %v267_v57, 0.0 }
  0xf9   :  { %v1711_v54 = vpop.f32.mrf.mxu0 }
  0xfa   :  { %v270_v56 = vadd.f32 %v1711_v54, %v2107_v11  ;;  %1752 = vmatprep.mubr.bf16.mxu1 %v373_v52  ;;  %v349_v62 = vmax.f32 %v259_v55, 0.0 }
  0xfb   :  { %v261_v58 = vpop.f32.mrf.mxu0  ;;  %1753 = vmatmul.mubr.bf16.gmra.mxu1 %v374_v53 }
  0xfc   :  { %v262_v59 = vadd.f32 %v2107_v11, %v261_v58  ;;  %v352_v60 = vmax.f32 %v270_v56, 0.0 }
  0xfd   :  { %v1714_v61 = vpop.f32.mrf.mxu0 }
  0xfe   :  { %v350_v63 = vmax.f32 %v262_v59, 0.0  ;;  %v376_v3 = vpack.c.bf16 %v352_v60, %v351_v0  ;;  %v283_v7 = vadd.f32 %v1714_v61, %v2107_v11  ;;  %v1894_v59 = vld [vmem:[%s2329_s2 + $0x40] sm:$0xff]   ;;  %v1895_v60 = vld [vmem:[%s2329_s2 + $0xb8] sm:$0xff]   ;;  %v1897_v61 = vld [vmem:[%s2329_s2 + $0xa8] sm:$0xff]  }
  0xff   :  { %v274_v1 = vpop.f32.mrf.mxu0  ;;  %1790 = vmatprep.subr.bf16.mxu0 %v1894_v59  ;;  %1824 = vmatprep.subr.bf16.mxu1 %v1895_v60  ;;  %v1900_v0 = vld [vmem:[%s2329_s2 + $0x90] sm:$0xff]  }
 0x100   :  { %v375_v2 = vpack.c.bf16 %v350_v63, %v349_v62  ;;  %v275_v5 = vadd.f32 %v2107_v11, %v274_v1  ;;  %v355_v15 = vmax.f32 %v283_v7, 0.0  ;;  %1791 = vmatpush3.bf16.msra.mxu0 %v1894_v59  ;;  %1825 = vmatpush3.bf16.msra.mxu1 %v1895_v60  ;;  %v1898_v62 = vld [vmem:[%s2329_s2 + $0xa0] sm:$0xff]   ;;  %v1899_v63 = vld [vmem:[%s2329_s2 + $0x98] sm:$0xff]   ;;  %v1901_v1 = vld [vmem:[%s2329_s2 + $0x88] sm:$0xff]  }
 0x101   :  { %v1715_v4 = vpop.f32.mrf.mxu0 }
 0x102   :  { %v286_v6 = vadd.f32 %v1715_v4, %v2107_v11  ;;  %1756 = vmatprep.mubr.bf16.mxu1 %v375_v2  ;;  %v353_v13 = vmax.f32 %v275_v5, 0.0  ;;  %v2168_v4 = vld [vmem:[%s2330_s3 + $0x1] ss:$0 sm:$0xff] }
 0x103   :  { %v277_v8 = vpop.f32.mrf.mxu0  ;;  %1757 = vmatmul.mubr.bf16.gmra.mxu1 %v376_v3 }
 0x104   :  { %v278_v9 = vadd.f32 %v2107_v11, %v277_v8  ;;  %v356_v10 = vmax.f32 %v286_v6, 0.0 }
 0x105   :  { %v1718_v12 = vpop.f32.mrf.mxu0 }
 0x106   :  { %v354_v14 = vmax.f32 %v278_v9, 0.0  ;;  %v378_v18 = vpack.c.bf16 %v356_v10, %v355_v15  ;;  %v299_v22 = vadd.f32 %v1718_v12, %v2107_v11 }
 0x107   :  { %v290_v16 = vpop.f32.mrf.mxu0 }
 0x108   :  { %v377_v17 = vpack.c.bf16 %v354_v14, %v353_v13  ;;  %v291_v20 = vadd.f32 %v2107_v11, %v290_v16  ;;  %v359_v29 = vmax.f32 %v299_v22, 0.0 }
 0x109   :  { %v1719_v19 = vpop.f32.mrf.mxu0 }
 0x10a   :  { %v302_v21 = vadd.f32 %v1719_v19, %v2107_v11  ;;  %1760 = vmatprep.mubr.bf16.mxu1 %v377_v17  ;;  %v357_v27 = vmax.f32 %v291_v20, 0.0 }
 0x10b   :  { %v293_v23 = vpop.f32.mrf.mxu0  ;;  %1761 = vmatmul.mubr.bf16.gmra.mxu1 %v378_v18 }
 0x10c   :  { %v294_v24 = vadd.f32 %v2107_v11, %v293_v23  ;;  %v360_v25 = vmax.f32 %v302_v21, 0.0 }
 0x10d   :  { %v1722_v26 = vpop.f32.mrf.mxu0 }
 0x10e   :  { %v358_v28 = vmax.f32 %v294_v24, 0.0  ;;  %v380_v32 = vpack.c.bf16 %v360_v25, %v359_v29  ;;  %v315_v36 = vadd.f32 %v1722_v26, %v2107_v11 }
 0x10f   :  { %v306_v30 = vpop.f32.mrf.mxu0 }
 0x110   :  { %v379_v31 = vpack.c.bf16 %v358_v28, %v357_v27  ;;  %v307_v34 = vadd.f32 %v2107_v11, %v306_v30  ;;  %v363_v43 = vmax.f32 %v315_v36, 0.0 }
 0x111   :  { %v1723_v33 = vpop.f32.mrf.mxu0 }
 0x112   :  { %v318_v35 = vadd.f32 %v1723_v33, %v2107_v11  ;;  %1764 = vmatprep.mubr.bf16.mxu1 %v379_v31  ;;  %v361_v41 = vmax.f32 %v307_v34, 0.0 }
 0x113   :  { %v309_v37 = vpop.f32.mrf.mxu0  ;;  %1765 = vmatmul.mubr.bf16.gmra.mxu1 %v380_v32 }
 0x114   :  { %v310_v38 = vadd.f32 %v2107_v11, %v309_v37  ;;  %v364_v39 = vmax.f32 %v318_v35, 0.0 }
 0x115   :  { %v1726_v40 = vpop.f32.mrf.mxu0 }
 0x116   :  { %v362_v42 = vmax.f32 %v310_v38, 0.0  ;;  %v382_v46 = vpack.c.bf16 %v364_v39, %v363_v43  ;;  %v331_v50 = vadd.f32 %v1726_v40, %v2107_v11 }
 0x117   :  { %v322_v44 = vpop.f32.mrf.mxu0 }
 0x118   :  { %v381_v45 = vpack.c.bf16 %v362_v42, %v361_v41  ;;  %v323_v48 = vadd.f32 %v2107_v11, %v322_v44  ;;  %v367_v56 = vmax.f32 %v331_v50, 0.0 }
 0x119   :  { %v1727_v47 = vpop.f32.mrf.mxu0 }
 0x11a   :  { %v334_v49 = vadd.f32 %v1727_v47, %v2107_v11  ;;  %1768 = vmatprep.mubr.bf16.mxu1 %v381_v45  ;;  %v365_v54 = vmax.f32 %v323_v48, 0.0 }
 0x11b   :  { %v325_v51 = vpop.f32.mrf.mxu0  ;;  %1769 = vmatmul.mubr.bf16.gmra.mxu1 %v382_v46 }
 0x11c   :  { %v326_v52 = vadd.f32 %v2107_v11, %v325_v51  ;;  %v368_v53 = vmax.f32 %v334_v49, 0.0  ;;  %v1896_v11 = vld [vmem:[%s2329_s2 + $0xb0] sm:$0xff]  }
 0x11d   :  { %1826 = vmatprep.subr.bf16.mxu1 %v1896_v11 }
 0x11e   :  { %v366_v55 = vmax.f32 %v326_v52, 0.0  ;;  %v384_v58 = vpack.c.bf16 %v368_v53, %v367_v56  ;;  %1827 = vmatpush3.bf16.msra.mxu1 %v1896_v11 }
 0x11f   :  { %1828 = vmatprep.subr.bf16.mxu1 %v1897_v61 }
 0x120   :  { %v383_v57 = vpack.c.bf16 %v366_v55, %v365_v54 }
 0x122   :  { %1772 = vmatprep.mubr.bf16.mxu1 %v383_v57  ;;  %1829 = vmatpush3.bf16.msra.mxu1 %v1897_v61 }
 0x123   :  { %1773 = vmatmul.mubr.bf16.gmra.mxu1 %v384_v58  ;;  %1830 = vmatprep.subr.bf16.mxu1 %v1898_v62 }
 0x126   :  { %1831 = vmatpush3.bf16.msra.mxu1 %v1898_v62 }
 0x127   :  { %1832 = vmatprep.subr.bf16.mxu1 %v1899_v63 }
 0x12a   :  { %1833 = vmatpush3.bf16.msra.mxu1 %v1899_v63 }
 0x12b   :  { %1834 = vmatprep.subr.bf16.mxu1 %v1900_v0 }
 0x12e   :  { %1835 = vmatpush3.bf16.msra.mxu1 %v1900_v0 }
 0x12f   :  { %1836 = vmatprep.subr.bf16.mxu1 %v1901_v1 }
 0x132   :  { %1837 = vmatpush3.bf16.msra.mxu1 %v1901_v1 }
 0x1ab   :  { %v1746_v2 = vpop.f32.mrf.mxu1 }
 0x1ac   :  { %v500_v8 = vadd.f32 %v1746_v2, %v2168_v4 }
 0x1ad   :  { %v491_v3 = vpop.f32.mrf.mxu1 }
 0x1ae   :  { %v492_v6 = vadd.f32 %v2168_v4, %v491_v3  ;;  %v620_v16 = vmax.f32 %v500_v8, 0.0 }
 0x1af   :  { %v1747_v5 = vpop.f32.mrf.mxu1 }
 0x1b0   :  { %v503_v7 = vadd.f32 %v1747_v5, %v2168_v4  ;;  %v618_v14 = vmax.f32 %v492_v6, 0.0 }
 0x1b1   :  { %v494_v9 = vpop.f32.mrf.mxu1 }
 0x1b2   :  { %v495_v10 = vadd.f32 %v2168_v4, %v494_v9  ;;  %v621_v12 = vmax.f32 %v503_v7, 0.0 }
 0x1b3   :  { %v1750_v13 = vpop.f32.mrf.mxu1 }
 0x1b4   :  { %v619_v15 = vmax.f32 %v495_v10, 0.0  ;;  %v651_v19 = vpack.c.bf16 %v621_v12, %v620_v16  ;;  %v516_v23 = vadd.f32 %v1750_v13, %v2168_v4 }
 0x1b5   :  { %v507_v17 = vpop.f32.mrf.mxu1 }
 0x1b6   :  { %v650_v18 = vpack.c.bf16 %v619_v15, %v618_v14  ;;  %v508_v21 = vadd.f32 %v2168_v4, %v507_v17  ;;  %v624_v30 = vmax.f32 %v516_v23, 0.0 }
 0x1b7   :  { %v1751_v20 = vpop.f32.mrf.mxu1 }
 0x1b8   :  { %v519_v22 = vadd.f32 %v1751_v20, %v2168_v4  ;;  %1792 = vmatprep.mubr.bf16.mxu0 %v650_v18  ;;  %v622_v28 = vmax.f32 %v508_v21, 0.0 }
 0x1b9   :  { %v510_v24 = vpop.f32.mrf.mxu1  ;;  %1793 = vmatmul.mubr.bf16.vlgmr.msra.gmra.mxu0 %v651_v19 }
 0x1ba   :  { %v511_v25 = vadd.f32 %v2168_v4, %v510_v24  ;;  %v625_v26 = vmax.f32 %v519_v22, 0.0 }
 0x1bb   :  { %v1754_v27 = vpop.f32.mrf.mxu1 }
 0x1bc   :  { %v623_v29 = vmax.f32 %v511_v25, 0.0  ;;  %v653_v33 = vpack.c.bf16 %v625_v26, %v624_v30  ;;  %v532_v37 = vadd.f32 %v1754_v27, %v2168_v4 }
 0x1bd   :  { %v523_v31 = vpop.f32.mrf.mxu1 }
 0x1be   :  { %v652_v32 = vpack.c.bf16 %v623_v29, %v622_v28  ;;  %v524_v35 = vadd.f32 %v2168_v4, %v523_v31  ;;  %v628_v44 = vmax.f32 %v532_v37, 0.0 }
 0x1bf   :  { %v1755_v34 = vpop.f32.mrf.mxu1 }
 0x1c0   :  { %v535_v36 = vadd.f32 %v1755_v34, %v2168_v4  ;;  %1796 = vmatprep.mubr.bf16.mxu0 %v652_v32  ;;  %v626_v42 = vmax.f32 %v524_v35, 0.0 }
 0x1c1   :  { %v526_v38 = vpop.f32.mrf.mxu1  ;;  %1797 = vmatmul.mubr.bf16.gmra.mxu0 %v653_v33 }
 0x1c2   :  { %v527_v39 = vadd.f32 %v2168_v4, %v526_v38  ;;  %v629_v40 = vmax.f32 %v535_v36, 0.0 }
 0x1c3   :  { %v1758_v41 = vpop.f32.mrf.mxu1 }
 0x1c4   :  { %v627_v43 = vmax.f32 %v527_v39, 0.0  ;;  %v655_v47 = vpack.c.bf16 %v629_v40, %v628_v44  ;;  %v548_v51 = vadd.f32 %v1758_v41, %v2168_v4 }
 0x1c5   :  { %v539_v45 = vpop.f32.mrf.mxu1 }
 0x1c6   :  { %v654_v46 = vpack.c.bf16 %v627_v43, %v626_v42  ;;  %v540_v49 = vadd.f32 %v2168_v4, %v539_v45  ;;  %v632_v58 = vmax.f32 %v548_v51, 0.0 }
 0x1c7   :  { %v1759_v48 = vpop.f32.mrf.mxu1 }
 0x1c8   :  { %v551_v50 = vadd.f32 %v1759_v48, %v2168_v4  ;;  %1800 = vmatprep.mubr.bf16.mxu0 %v654_v46  ;;  %v630_v56 = vmax.f32 %v540_v49, 0.0 }
 0x1c9   :  { %v542_v52 = vpop.f32.mrf.mxu1  ;;  %1801 = vmatmul.mubr.bf16.gmra.mxu0 %v655_v47 }
 0x1ca   :  { %v543_v53 = vadd.f32 %v2168_v4, %v542_v52  ;;  %v633_v54 = vmax.f32 %v551_v50, 0.0 }
 0x1cb   :  { %v1762_v55 = vpop.f32.mrf.mxu1 }
 0x1cc   :  { %v631_v57 = vmax.f32 %v543_v53, 0.0  ;;  %v657_v11 = vpack.c.bf16 %v633_v54, %v632_v58  ;;  %v564_v0 = vadd.f32 %v1762_v55, %v2168_v4  ;;  %v1902_v53 = vld [vmem:[%s2329_s2 + $0x80] sm:$0xff]  }
 0x1cd   :  { %v555_v59 = vpop.f32.mrf.mxu1  ;;  %1838 = vmatprep.subr.bf16.mxu1 %v1902_v53 }
 0x1ce   :  { %v656_v60 = vpack.c.bf16 %v631_v57, %v630_v56  ;;  %v556_v62 = vadd.f32 %v2168_v4, %v555_v59  ;;  %v636_v8 = vmax.f32 %v564_v0, 0.0  ;;  %1839 = vmatpush3.bf16.msra.mxu1 %v1902_v53 }
 0x1cf   :  { %v1763_v61 = vpop.f32.mrf.mxu1 }
 0x1d0   :  { %v567_v63 = vadd.f32 %v1763_v61, %v2168_v4  ;;  %1804 = vmatprep.mubr.bf16.mxu0 %v656_v60  ;;  %v634_v6 = vmax.f32 %v556_v62, 0.0 }
 0x1d1   :  { %v558_v1 = vpop.f32.mrf.mxu1  ;;  %1805 = vmatmul.mubr.bf16.gmra.mxu0 %v657_v11 }
 0x1d2   :  { %v559_v2 = vadd.f32 %v2168_v4, %v558_v1  ;;  %v637_v3 = vmax.f32 %v567_v63, 0.0 }
 0x1d3   :  { %v1766_v5 = vpop.f32.mrf.mxu1 }
 0x1d4   :  { %v635_v7 = vmax.f32 %v559_v2, 0.0  ;;  %v659_v12 = vpack.c.bf16 %v637_v3, %v636_v8  ;;  %v580_v16 = vadd.f32 %v1766_v5, %v2168_v4 }
 0x1d5   :  { %v571_v9 = vpop.f32.mrf.mxu1 }
 0x1d6   :  { %v658_v10 = vpack.c.bf16 %v635_v7, %v634_v6  ;;  %v572_v14 = vadd.f32 %v2168_v4, %v571_v9  ;;  %v640_v23 = vmax.f32 %v580_v16, 0.0 }
 0x1d7   :  { %v1767_v13 = vpop.f32.mrf.mxu1 }
 0x1d8   :  { %v583_v15 = vadd.f32 %v1767_v13, %v2168_v4  ;;  %1808 = vmatprep.mubr.bf16.mxu0 %v658_v10  ;;  %v638_v21 = vmax.f32 %v572_v14, 0.0 }
 0x1d9   :  { %v574_v17 = vpop.f32.mrf.mxu1  ;;  %1809 = vmatmul.mubr.bf16.gmra.mxu0 %v659_v12 }
 0x1da   :  { %v575_v18 = vadd.f32 %v2168_v4, %v574_v17  ;;  %v641_v19 = vmax.f32 %v583_v15, 0.0 }
 0x1db   :  { %v1770_v20 = vpop.f32.mrf.mxu1 }
 0x1dc   :  { %v639_v22 = vmax.f32 %v575_v18, 0.0  ;;  %v661_v26 = vpack.c.bf16 %v641_v19, %v640_v23  ;;  %v596_v30 = vadd.f32 %v1770_v20, %v2168_v4 }
 0x1dd   :  { %v587_v24 = vpop.f32.mrf.mxu1 }
 0x1de   :  { %v660_v25 = vpack.c.bf16 %v639_v22, %v638_v21  ;;  %v588_v28 = vadd.f32 %v2168_v4, %v587_v24  ;;  %v644_v37 = vmax.f32 %v596_v30, 0.0 }
 0x1df   :  { %v1771_v27 = vpop.f32.mrf.mxu1 }
 0x1e0   :  { %v599_v29 = vadd.f32 %v1771_v27, %v2168_v4  ;;  %1812 = vmatprep.mubr.bf16.mxu0 %v660_v25  ;;  %v642_v35 = vmax.f32 %v588_v28, 0.0 }
 0x1e1   :  { %v590_v31 = vpop.f32.mrf.mxu1  ;;  %1813 = vmatmul.mubr.bf16.gmra.mxu0 %v661_v26 }
 0x1e2   :  { %v591_v32 = vadd.f32 %v2168_v4, %v590_v31  ;;  %v645_v33 = vmax.f32 %v599_v29, 0.0 }
 0x1e3   :  { %v1774_v34 = vpop.f32.mrf.mxu1 }
 0x1e4   :  { %v643_v36 = vmax.f32 %v591_v32, 0.0  ;;  %v663_v40 = vpack.c.bf16 %v645_v33, %v644_v37  ;;  %v612_v44 = vadd.f32 %v1774_v34, %v2168_v4 }
 0x1e5   :  { %v603_v38 = vpop.f32.mrf.mxu1 }
 0x1e6   :  { %v662_v39 = vpack.c.bf16 %v643_v36, %v642_v35  ;;  %v604_v42 = vadd.f32 %v2168_v4, %v603_v38  ;;  %v648_v50 = vmax.f32 %v612_v44, 0.0 }
 0x1e7   :  { %v1775_v41 = vpop.f32.mrf.mxu1 }
 0x1e8   :  { %v615_v43 = vadd.f32 %v1775_v41, %v2168_v4  ;;  %1816 = vmatprep.mubr.bf16.mxu0 %v662_v39  ;;  %v646_v48 = vmax.f32 %v604_v42, 0.0 }
 0x1e9   :  { %v606_v45 = vpop.f32.mrf.mxu1  ;;  %1817 = vmatmul.mubr.bf16.gmra.mxu0 %v663_v40 }
 0x1ea   :  { %v607_v46 = vadd.f32 %v2168_v4, %v606_v45  ;;  %v649_v47 = vmax.f32 %v615_v43, 0.0  ;;  %v2208_v4 = vld [vmem:[%s2330_s3 + $0x2] ss:$0 sm:$0xff] }
 0x1ec   :  { %v647_v49 = vmax.f32 %v607_v46, 0.0  ;;  %v665_v52 = vpack.c.bf16 %v649_v47, %v648_v50 }
 0x1ee   :  { %v664_v51 = vpack.c.bf16 %v647_v49, %v646_v48 }
 0x1f0   :  { %1820 = vmatprep.mubr.bf16.mxu0 %v664_v51 }
 0x1f1   :  { %1821 = vmatmul.mubr.bf16.gmra.mxu0 %v665_v52 }
 0x279   :  { %v1794_v54 = vpop.f32.mrf.mxu0 }
 0x27a   :  { %v782_v59 = vadd.f32 %v1794_v54, %v2208_v4 }
 0x27b   :  { %v773_v55 = vpop.f32.mrf.mxu0 }
 0x27c   :  { %v774_v57 = vadd.f32 %v2208_v4, %v773_v55  ;;  %v902_v1 = vmax.f32 %v782_v59, 0.0 }
 0x27d   :  { %v1795_v56 = vpop.f32.mrf.mxu0 }
 0x27e   :  { %v785_v58 = vadd.f32 %v1795_v56, %v2208_v4  ;;  %v900_v63 = vmax.f32 %v774_v57, 0.0 }
 0x27f   :  { %v776_v60 = vpop.f32.mrf.mxu0 }
 0x280   :  { %v777_v11 = vadd.f32 %v2208_v4, %v776_v60  ;;  %v903_v61 = vmax.f32 %v785_v58, 0.0 }
 0x281   :  { %v1798_v62 = vpop.f32.mrf.mxu0 }
 0x282   :  { %v901_v0 = vmax.f32 %v777_v11, 0.0  ;;  %v933_v5 = vpack.c.bf16 %v903_v61, %v902_v1  ;;  %v798_v9 = vadd.f32 %v1798_v62, %v2208_v4 }
 0x283   :  { %v789_v2 = vpop.f32.mrf.mxu0 }
 0x284   :  { %v932_v3 = vpack.c.bf16 %v901_v0, %v900_v63  ;;  %v790_v7 = vadd.f32 %v2208_v4, %v789_v2  ;;  %v906_v17 = vmax.f32 %v798_v9, 0.0 }
 0x285   :  { %v1799_v6 = vpop.f32.mrf.mxu0 }
 0x286   :  { %v801_v8 = vadd.f32 %v1799_v6, %v2208_v4  ;;  %1840 = vmatprep.mubr.bf16.mxu1 %v932_v3  ;;  %v904_v15 = vmax.f32 %v790_v7, 0.0 }
 0x287   :  { %v792_v10 = vpop.f32.mrf.mxu0  ;;  %1841 = vmatmul.mubr.bf16.vlgmr.msra.gmra.mxu1 %v933_v5 }
 0x288   :  { %v793_v12 = vadd.f32 %v2208_v4, %v792_v10  ;;  %v907_v13 = vmax.f32 %v801_v8, 0.0 }
 0x289   :  { %v1802_v14 = vpop.f32.mrf.mxu0 }
 0x28a   :  { %v905_v16 = vmax.f32 %v793_v12, 0.0  ;;  %v935_v20 = vpack.c.bf16 %v907_v13, %v906_v17  ;;  %v814_v24 = vadd.f32 %v1802_v14, %v2208_v4 }
 0x28b   :  { %v805_v18 = vpop.f32.mrf.mxu0 }
 0x28c   :  { %v934_v19 = vpack.c.bf16 %v905_v16, %v904_v15  ;;  %v806_v22 = vadd.f32 %v2208_v4, %v805_v18  ;;  %v910_v31 = vmax.f32 %v814_v24, 0.0 }
 0x28d   :  { %v1803_v21 = vpop.f32.mrf.mxu0 }
 0x28e   :  { %v817_v23 = vadd.f32 %v1803_v21, %v2208_v4  ;;  %1844 = vmatprep.mubr.bf16.mxu1 %v934_v19  ;;  %v908_v29 = vmax.f32 %v806_v22, 0.0 }
 0x28f   :  { %v808_v25 = vpop.f32.mrf.mxu0  ;;  %1845 = vmatmul.mubr.bf16.gmra.mxu1 %v935_v20 }
 0x290   :  { %v809_v26 = vadd.f32 %v2208_v4, %v808_v25  ;;  %v911_v27 = vmax.f32 %v817_v23, 0.0 }
 0x291   :  { %v1806_v28 = vpop.f32.mrf.mxu0 }
 0x292   :  { %v909_v30 = vmax.f32 %v809_v26, 0.0  ;;  %v937_v34 = vpack.c.bf16 %v911_v27, %v910_v31  ;;  %v830_v38 = vadd.f32 %v1806_v28, %v2208_v4 }
 0x293   :  { %v821_v32 = vpop.f32.mrf.mxu0 }
 0x294   :  { %v936_v33 = vpack.c.bf16 %v909_v30, %v908_v29  ;;  %v822_v36 = vadd.f32 %v2208_v4, %v821_v32  ;;  %v914_v45 = vmax.f32 %v830_v38, 0.0 }
 0x295   :  { %v1807_v35 = vpop.f32.mrf.mxu0 }
 0x296   :  { %v833_v37 = vadd.f32 %v1807_v35, %v2208_v4  ;;  %1848 = vmatprep.mubr.bf16.mxu1 %v936_v33  ;;  %v912_v43 = vmax.f32 %v822_v36, 0.0 }
 0x297   :  { %v824_v39 = vpop.f32.mrf.mxu0  ;;  %1849 = vmatmul.mubr.bf16.gmra.mxu1 %v937_v34 }
 0x298   :  { %v825_v40 = vadd.f32 %v2208_v4, %v824_v39  ;;  %v915_v41 = vmax.f32 %v833_v37, 0.0 }
 0x299   :  { %v1810_v42 = vpop.f32.mrf.mxu0 }
 0x29a   :  { %v913_v44 = vmax.f32 %v825_v40, 0.0  ;;  %v939_v48 = vpack.c.bf16 %v915_v41, %v914_v45  ;;  %v846_v52 = vadd.f32 %v1810_v42, %v2208_v4  ;;  %v2245_v41 = vld [vmem:[%s2330_s3 + $0x3] ss:$0 sm:$0xff] }
 0x29b   :  { %v837_v46 = vpop.f32.mrf.mxu0 }
 0x29c   :  { %v938_v47 = vpack.c.bf16 %v913_v44, %v912_v43  ;;  %v838_v50 = vadd.f32 %v2208_v4, %v837_v46  ;;  %v918_v59 = vmax.f32 %v846_v52, 0.0 }
 0x29d   :  { %v1811_v49 = vpop.f32.mrf.mxu0 }
 0x29e   :  { %v849_v51 = vadd.f32 %v1811_v49, %v2208_v4  ;;  %1852 = vmatprep.mubr.bf16.mxu1 %v938_v47  ;;  %v916_v57 = vmax.f32 %v838_v50, 0.0 }
 0x29f   :  { %v840_v53 = vpop.f32.mrf.mxu0  ;;  %1853 = vmatmul.mubr.bf16.gmra.mxu1 %v939_v48 }
 0x2a0   :  { %v841_v54 = vadd.f32 %v2208_v4, %v840_v53  ;;  %v919_v55 = vmax.f32 %v849_v51, 0.0 }
 0x2a1   :  { %v1814_v56 = vpop.f32.mrf.mxu0 }
 0x2a2   :  { %v917_v58 = vmax.f32 %v841_v54, 0.0  ;;  %v941_v61 = vpack.c.bf16 %v919_v55, %v918_v59  ;;  %v862_v1 = vadd.f32 %v1814_v56, %v2208_v4 }
 0x2a3   :  { %v853_v60 = vpop.f32.mrf.mxu0 }
 0x2a4   :  { %v940_v11 = vpack.c.bf16 %v917_v58, %v916_v57  ;;  %v854_v63 = vadd.f32 %v2208_v4, %v853_v60  ;;  %v922_v9 = vmax.f32 %v862_v1, 0.0 }
 0x2a5   :  { %v1815_v62 = vpop.f32.mrf.mxu0 }
 0x2a6   :  { %v865_v0 = vadd.f32 %v1815_v62, %v2208_v4  ;;  %1856 = vmatprep.mubr.bf16.mxu1 %v940_v11  ;;  %v920_v7 = vmax.f32 %v854_v63, 0.0 }
 0x2a7   :  { %v856_v2 = vpop.f32.mrf.mxu0  ;;  %1857 = vmatmul.mubr.bf16.gmra.mxu1 %v941_v61 }
 0x2a8   :  { %v857_v3 = vadd.f32 %v2208_v4, %v856_v2  ;;  %v923_v5 = vmax.f32 %v865_v0, 0.0 }
 0x2a9   :  { %v1818_v6 = vpop.f32.mrf.mxu0 }
 0x2aa   :  { %v921_v8 = vmax.f32 %v857_v3, 0.0  ;;  %v943_v13 = vpack.c.bf16 %v923_v5, %v922_v9  ;;  %v878_v17 = vadd.f32 %v1818_v6, %v2208_v4 }
 0x2ab   :  { %v869_v10 = vpop.f32.mrf.mxu0 }
 0x2ac   :  { %v942_v12 = vpack.c.bf16 %v921_v8, %v920_v7  ;;  %v870_v15 = vadd.f32 %v2208_v4, %v869_v10  ;;  %v926_v24 = vmax.f32 %v878_v17, 0.0 }
 0x2ad   :  { %v1819_v14 = vpop.f32.mrf.mxu0 }
 0x2ae   :  { %v881_v16 = vadd.f32 %v1819_v14, %v2208_v4  ;;  %1860 = vmatprep.mubr.bf16.mxu1 %v942_v12  ;;  %v924_v22 = vmax.f32 %v870_v15, 0.0 }
 0x2af   :  { %v872_v18 = vpop.f32.mrf.mxu0  ;;  %1861 = vmatmul.mubr.bf16.gmra.mxu1 %v943_v13 }
 0x2b0   :  { %v873_v19 = vadd.f32 %v2208_v4, %v872_v18  ;;  %v927_v20 = vmax.f32 %v881_v16, 0.0 }
 0x2b1   :  { %v1822_v21 = vpop.f32.mrf.mxu0 }
 0x2b2   :  { %v925_v23 = vmax.f32 %v873_v19, 0.0  ;;  %v945_v27 = vpack.c.bf16 %v927_v20, %v926_v24  ;;  %v894_v31 = vadd.f32 %v1822_v21, %v2208_v4 }
 0x2b3   :  { %v885_v25 = vpop.f32.mrf.mxu0 }
 0x2b4   :  { %v944_v26 = vpack.c.bf16 %v925_v23, %v924_v22  ;;  %v886_v29 = vadd.f32 %v2208_v4, %v885_v25  ;;  %v930_v37 = vmax.f32 %v894_v31, 0.0 }
 0x2b5   :  { %v1823_v28 = vpop.f32.mrf.mxu0 }
 0x2b6   :  { %v897_v30 = vadd.f32 %v1823_v28, %v2208_v4  ;;  %1864 = vmatprep.mubr.bf16.mxu1 %v944_v26  ;;  %v928_v35 = vmax.f32 %v886_v29, 0.0 }
 0x2b7   :  { %v888_v32 = vpop.f32.mrf.mxu0  ;;  %1865 = vmatmul.mubr.bf16.gmra.mxu1 %v945_v27 }
 0x2b8   :  { %v889_v33 = vadd.f32 %v2208_v4, %v888_v32  ;;  %v931_v34 = vmax.f32 %v897_v30, 0.0 }
 0x2ba   :  { %v929_v36 = vmax.f32 %v889_v33, 0.0  ;;  %v947_v39 = vpack.c.bf16 %v931_v34, %v930_v37 }
 0x2bc   :  { %v946_v38 = vpack.c.bf16 %v929_v36, %v928_v35 }
 0x2be   :  { %1868 = vmatprep.mubr.bf16.mxu1 %v946_v38 }
 0x2bf   :  { %1869 = vmatmul.mubr.bf16.gmra.mxu1 %v947_v39 }
 0x347   :  { %v1842_v40 = vpop.f32.mrf.mxu1 }
 0x348   :  { %v1064_v44 = vadd.f32 %v1842_v40, %v2245_v41 }
 0x349   :  { %v1055_v42 = vpop.f32.mrf.mxu1 }
 0x34a   :  { %v1056_v46 = vadd.f32 %v2245_v41, %v1055_v42 }
 0x34b   :  { %v1843_v43 = vpop.f32.mrf.mxu1 }
 0x34c   :  { %v1067_v4 = vadd.f32 %v1843_v43, %v2245_v41 }
 0x34d   :  { %v1058_v45 = vpop.f32.mrf.mxu1 }
 0x34e   :  { %v1503_v47 = vpack.c.bf16 %v1067_v4, %v1064_v44  ;;  %v1059_v48 = vadd.f32 %v2245_v41, %v1058_v45 }
 0x34f   :  { %v1846_v49 = vpop.f32.mrf.mxu1 }
 0x350   :  { %1575 = vst [vmem:[%s2331_s4 + $0x8] sm:$0xff] %v1503_v47   ;;  %v1498_v50 = vpack.c.bf16 %v1059_v48, %v1056_v46  ;;  %v1080_v53 = vadd.f32 %v1846_v49, %v2245_v41 }
 0x351   :  { %v1071_v51 = vpop.f32.mrf.mxu1 }
 0x352   :  { %1499 = vst [vmem:[%s2331_s4] sm:$0xff] %v1498_v50   ;;  %v1072_v56 = vadd.f32 %v2245_v41, %v1071_v51 }
 0x353   :  { %v1847_v52 = vpop.f32.mrf.mxu1 }
 0x354   :  { %v1083_v54 = vadd.f32 %v1847_v52, %v2245_v41 }
 0x355   :  { %v1074_v55 = vpop.f32.mrf.mxu1 }
 0x356   :  { %v1513_v57 = vpack.c.bf16 %v1083_v54, %v1080_v53  ;;  %v1075_v58 = vadd.f32 %v2245_v41, %v1074_v55 }
 0x357   :  { %v1850_v59 = vpop.f32.mrf.mxu1 }
 0x358   :  { %1577 = vst [vmem:[%s2331_s4 + $0x18] sm:$0xff] %v1513_v57   ;;  %v1508_v60 = vpack.c.bf16 %v1075_v58, %v1072_v56  ;;  %v1096_v62 = vadd.f32 %v1850_v59, %v2245_v41 }
 0x359   :  { %v1087_v11 = vpop.f32.mrf.mxu1 }
 0x35a   :  { %1576 = vst [vmem:[%s2331_s4 + $0x10] sm:$0xff] %v1508_v60   ;;  %v1088_v1 = vadd.f32 %v2245_v41, %v1087_v11 }
 0x35b   :  { %v1851_v61 = vpop.f32.mrf.mxu1 }
 0x35c   :  { %v1099_v63 = vadd.f32 %v1851_v61, %v2245_v41 }
 0x35d   :  { %v1090_v0 = vpop.f32.mrf.mxu1 }
 0x35e   :  { %v1523_v2 = vpack.c.bf16 %v1099_v63, %v1096_v62  ;;  %v1091_v3 = vadd.f32 %v2245_v41, %v1090_v0 }
 0x35f   :  { %v1854_v5 = vpop.f32.mrf.mxu1 }
 0x360   :  { %1579 = vst [vmem:[%s2331_s4 + $0x28] sm:$0xff] %v1523_v2   ;;  %v1518_v6 = vpack.c.bf16 %v1091_v3, %v1088_v1  ;;  %v1112_v9 = vadd.f32 %v1854_v5, %v2245_v41 }
 0x361   :  { %v1103_v7 = vpop.f32.mrf.mxu1 }
 0x362   :  { %1578 = vst [vmem:[%s2331_s4 + $0x20] sm:$0xff] %v1518_v6   ;;  %v1104_v13 = vadd.f32 %v2245_v41, %v1103_v7 }
 0x363   :  { %v1855_v8 = vpop.f32.mrf.mxu1 }
 0x364   :  { %v1115_v10 = vadd.f32 %v1855_v8, %v2245_v41 }
 0x365   :  { %v1106_v12 = vpop.f32.mrf.mxu1 }
 0x366   :  { %v1533_v14 = vpack.c.bf16 %v1115_v10, %v1112_v9  ;;  %v1107_v15 = vadd.f32 %v2245_v41, %v1106_v12 }
 0x367   :  { %v1858_v16 = vpop.f32.mrf.mxu1 }
 0x368   :  { %1581 = vst [vmem:[%s2331_s4 + $0x38] sm:$0xff] %v1533_v14   ;;  %v1528_v17 = vpack.c.bf16 %v1107_v15, %v1104_v13  ;;  %v1128_v20 = vadd.f32 %v1858_v16, %v2245_v41 }
 0x369   :  { %v1119_v18 = vpop.f32.mrf.mxu1 }
 0x36a   :  { %1580 = vst [vmem:[%s2331_s4 + $0x30] sm:$0xff] %v1528_v17   ;;  %v1120_v23 = vadd.f32 %v2245_v41, %v1119_v18 }
 0x36b   :  { %v1859_v19 = vpop.f32.mrf.mxu1 }
 0x36c   :  { %v1131_v21 = vadd.f32 %v1859_v19, %v2245_v41 }
 0x36d   :  { %v1122_v22 = vpop.f32.mrf.mxu1 }
 0x36e   :  { %v1543_v24 = vpack.c.bf16 %v1131_v21, %v1128_v20  ;;  %v1123_v25 = vadd.f32 %v2245_v41, %v1122_v22 }
 0x36f   :  { %v1862_v26 = vpop.f32.mrf.mxu1 }
 0x370   :  { %1583 = vst [vmem:[%s2331_s4 + $0x48] sm:$0xff] %v1543_v24   ;;  %v1538_v27 = vpack.c.bf16 %v1123_v25, %v1120_v23  ;;  %v1144_v30 = vadd.f32 %v1862_v26, %v2245_v41 }
 0x371   :  { %v1135_v28 = vpop.f32.mrf.mxu1 }
 0x372   :  { %1582 = vst [vmem:[%s2331_s4 + $0x40] sm:$0xff] %v1538_v27   ;;  %v1136_v33 = vadd.f32 %v2245_v41, %v1135_v28 }
 0x373   :  { %v1863_v29 = vpop.f32.mrf.mxu1 }
 0x374   :  { %v1147_v31 = vadd.f32 %v1863_v29, %v2245_v41 }
 0x375   :  { %v1138_v32 = vpop.f32.mrf.mxu1 }
 0x376   :  { %v1553_v34 = vpack.c.bf16 %v1147_v31, %v1144_v30  ;;  %v1139_v35 = vadd.f32 %v2245_v41, %v1138_v32 }
 0x377   :  { %v1866_v36 = vpop.f32.mrf.mxu1 }
 0x378   :  { %1585 = vst [vmem:[%s2331_s4 + $0x58] sm:$0xff] %v1553_v34   ;;  %v1548_v37 = vpack.c.bf16 %v1139_v35, %v1136_v33  ;;  %v1160_v40 = vadd.f32 %v1866_v36, %v2245_v41 }
 0x379   :  { %v1151_v38 = vpop.f32.mrf.mxu1 }
 0x37a   :  { %1584 = vst [vmem:[%s2331_s4 + $0x50] sm:$0xff] %v1548_v37   ;;  %v1152_v44 = vadd.f32 %v2245_v41, %v1151_v38 }
 0x37b   :  { %v1867_v39 = vpop.f32.mrf.mxu1 }
 0x37c   :  { %v1163_v42 = vadd.f32 %v1867_v39, %v2245_v41 }
 0x37d   :  { %v1154_v43 = vpop.f32.mrf.mxu1 }
 0x37e   :  { %v1563_v4 = vpack.c.bf16 %v1163_v42, %v1160_v40  ;;  %v1155_v45 = vadd.f32 %v2245_v41, %v1154_v43 }
 0x37f   :  { %v1870_v46 = vpop.f32.mrf.mxu1 }
 0x380   :  { %1587 = vst [vmem:[%s2331_s4 + $0x68] sm:$0xff] %v1563_v4   ;;  %v1558_v47 = vpack.c.bf16 %v1155_v45, %v1152_v44  ;;  %v1176_v50 = vadd.f32 %v1870_v46, %v2245_v41 }
 0x381   :  { %v1167_v48 = vpop.f32.mrf.mxu1 }
 0x382   :  { %1586 = vst [vmem:[%s2331_s4 + $0x60] sm:$0xff] %v1558_v47   ;;  %v1168_v53 = vadd.f32 %v2245_v41, %v1167_v48 }
 0x383   :  { %v1871_v49 = vpop.f32.mrf.mxu1 }
 0x384   :  { %v1179_v51 = vadd.f32 %v1871_v49, %v2245_v41 }
 0x385   :  { %v1170_v52 = vpop.f32.mrf.mxu1 }
 0x386   :  { %v1573_v54 = vpack.c.bf16 %v1179_v51, %v1176_v50  ;;  %v1171_v55 = vadd.f32 %v2245_v41, %v1170_v52 }
 0x388   :  { %1589 = vst [vmem:[%s2331_s4 + $0x78] sm:$0xff] %v1573_v54   ;;  %v1568_v56 = vpack.c.bf16 %v1171_v55, %v1168_v53 }
 0x38a   :  { %1588 = vst [vmem:[%s2331_s4 + $0x70] sm:$0xff] %v1568_v56  }

</bundles_post_ra>
